<compile_context>
chip_gen: v5e
topology: v5e:2x2
jax: 0.10.0
libtpu: 0.0.40
codegen_flags: <defaults>
</compile_context>

<pallas_src>
import functools

import jax
import jax.numpy as jnp
from jax import lax
from jax.experimental import pallas as pl
from jax.experimental.pallas import tpu as pltpu


def _is_pow2(n):
    return n > 0 and (n & (n - 1)) == 0


def _scblock_conv_kernel(x_ref, y_ref, w_ref, b_ref, o_ref, xy_ref, patch_ref,
                         *, H, W, cin, cin_pad):
    """Fused (interleave-concat + 3x3 conv + bias + ReLU) for one batch tile.

    x_ref    : (Bt, C, H*W)        activations, spatial flattened on lanes
    y_ref    : (Bt, 1, H*W)        guidance map
    w_ref    : (Cout, 9*cin_pad)   repacked weights, col = (ky*3+kx)*cin_pad + c
    b_ref    : (Cout, 1)           bias
    o_ref    : (Bt, Cout, H*W)     lane-dense output (NCHW after reshape)
    xy_ref   : VMEM (cin, Bt*H*W)        fused-input staging
    patch_ref: VMEM (9*cin_pad, Bt*H*W)  im2col patch matrix
    """
    Bt = x_ref.shape[0]
    C = x_ref.shape[1]
    HW = H * W
    NL = Bt * HW

    # Stage the fused input: channel order [x_0..x_{C-1}, y]; batch folded onto
    # the lane axis at offsets b*HW.  (The channel permutation + y-summing that
    # emulates the interleaved concat lives in the repacked weights.)
    for b in range(Bt):
        xy_ref[0:C, b * HW:(b + 1) * HW] = x_ref[b]
        xy_ref[C:C + 1, b * HW:(b + 1) * HW] = y_ref[b]
    xy = xy_ref[...]                                       # (cin, NL)

    # Per-lane (row, col) position inside each HxW image.
    q = lax.broadcasted_iota(jnp.int32, (1, NL), 1)
    if _is_pow2(W) and _is_pow2(H):                        # shift/and fast path
        p = jnp.bitwise_and(q, HW - 1)
        row = jnp.right_shift(p, W.bit_length() - 1)
        col = jnp.bitwise_and(q, W - 1)
    else:
        p = q % HW
        row = p // W
        col = q % W

    # Build the im2col patch: 9 shifted + border-masked copies of the input.
    patch_ref[...] = jnp.zeros_like(patch_ref)             # keep pad rows finite
    for ky in range(3):
        for kx in range(3):
            dy, dx = ky - 1, kx - 1
            s = dy * W + dx                                # flattened tap offset
            # shifted[q] = xy[q + s]; every wrapped position is masked below.
            shifted = xy if s == 0 else pltpu.roll(xy, shift=(-s) % NL, axis=1)
            valid = ((row + dy >= 0) & (row + dy < H) &
                     (col + dx >= 0) & (col + dx < W))
            t = ky * 3 + kx
            patch_ref[t * cin_pad:t * cin_pad + cin, :] = jnp.where(
                valid, shifted, 0.0)

    # One MXU matmul: K = 9*cin_pad, N = Bt*H*W (lane-dense accumulator).
    acc = jnp.dot(w_ref[...], patch_ref[...],
                  preferred_element_type=jnp.float32)
    acc = jnp.maximum(acc + b_ref[...], 0.0)               # bias + ReLU(inplace)

    for b in range(Bt):
        o_ref[b] = acc[:, b * HW:(b + 1) * HW].astype(o_ref.dtype)


def _pick_batch_tile(B, HW):
    # Grow per-step work toward ~2048 output lanes, but keep >= 2 grid steps
    # when B >= 2 so the batch axis can still shard across TensorCores (v7x).
    bt = max(1, min(B, 2048 // max(HW, 1)))
    if B >= 2:
        bt = min(bt, max(1, B // 2))
    while B % bt:
        bt -= 1
    return bt


def scblock_conv3x3_relu(x3, y3, w_k, bias, *, H, W, cin, cin_pad,
                         batch_tile=None):
    """x3: (B, C, H*W); y3: (B, 1, H*W); w_k: (Cout, 9*cin_pad); bias: (Cout,)."""
    B, C, HW = x3.shape
    Cout = w_k.shape[0]
    bt = _pick_batch_tile(B, HW) if batch_tile is None else batch_tile
    b2 = bias.reshape(Cout, 1).astype(jnp.float32)

    kernel = functools.partial(_scblock_conv_kernel, H=H, W=W,
                               cin=cin, cin_pad=cin_pad)
    return pl.pallas_call(
        kernel,
        out_shape=jax.ShapeDtypeStruct((B, Cout, HW), jnp.float32),
        grid_spec=pltpu.PrefetchScalarGridSpec(
            num_scalar_prefetch=0,
            grid=(B // bt,),
            in_specs=[
                pl.BlockSpec((bt, C, HW), lambda i: (i, 0, 0)),
                pl.BlockSpec((bt, 1, HW), lambda i: (i, 0, 0)),
                pl.BlockSpec((Cout, 9 * cin_pad), lambda i: (0, 0)),
                pl.BlockSpec((Cout, 1), lambda i: (0, 0)),
            ],
            out_specs=pl.BlockSpec((bt, Cout, HW), lambda i: (i, 0, 0)),
            scratch_shapes=[
                pltpu.VMEM((cin, bt * HW), jnp.float32),
                pltpu.VMEM((9 * cin_pad, bt * HW), jnp.float32),
            ]),
        compiler_params=pltpu.CompilerParams(
            dimension_semantics=("parallel",)),
    )(x3, y3, w_k, b2)


class SCBlockPallas:
    """JAX/Pallas port of SCBlock. Parameters are deterministic synthetic values."""

    def __init__(self, channel, subchannel, key):
        self.channel = channel
        self.group = channel // subchannel
        if self.group not in (1, 2, 4, 8, 16, 32):
            raise Exception("Invalid Channel")
        sub = channel // self.group           # chunk size used by torch.chunk
        cin_cat = channel + self.group
        cout = channel

        k0, k1 = jax.random.split(key)
        fan_in = cin_cat * 9
        bound = 1.0 / (fan_in ** 0.5)
        # PyTorch conv weight layout: (Cout, Cin_cat, 3, 3).
        w_oihw = jax.random.uniform(k0, (cout, cin_cat, 3, 3), jnp.float32,
                                    minval=-bound, maxval=bound)
        self.bias = jax.random.uniform(k1, (cout,), jnp.float32,
                                       minval=-bound, maxval=bound)
        self._w_oihw = w_oihw                 # kept for the reference check

        # Fold the channel-interleaved concat into the weights:
        #   conv(x_cat, W) == conv(x, W[:, x_pos]) + conv(y, sum_g W[:, y_pos_g])
        x_pos, y_pos = [], []
        for g in range(self.group):
            base = g * (sub + 1)
            x_pos.extend(range(base, base + sub))
            y_pos.append(base + sub)
        w_x = w_oihw[:, jnp.array(x_pos)]                        # (Cout, C, 3, 3)
        w_y = w_oihw[:, jnp.array(y_pos)].sum(1, keepdims=True)  # (Cout, 1, 3, 3)
        w_comb = jnp.concatenate([w_x, w_y], axis=1)             # (Cout, C+1, 3, 3)

        # Repack as (Cout, 9*cin_pad): tap-major columns, per-tap channel group
        # padded to a sublane multiple so in-kernel im2col stores are aligned.
        self.cin = channel + 1
        self.cin_pad = ((self.cin + 7) // 8) * 8
        w_t = jnp.transpose(w_comb, (0, 2, 3, 1))                # (Cout, 3, 3, cin)
        w_pad = jnp.zeros((cout, 3, 3, self.cin_pad), jnp.float32)
        w_pad = w_pad.at[..., :self.cin].set(w_t)
        self.w_k = w_pad.reshape(cout, 9 * self.cin_pad)
        # TODO(synk): self.score conv exists in __init__ but is unused in forward; omitted.

    def __call__(self, x, y):
        B, C, H, W = x.shape
        out = scblock_conv3x3_relu(
            x.reshape(B, C, H * W), y.reshape(B, 1, H * W),
            self.w_k, self.bias, H=H, W=W, cin=self.cin, cin_pad=self.cin_pad)
        return out.reshape(B, self.channel, H, W)


def _build_xcat_ref(x, y, group):
    sub = x.shape[1] // group
    parts = []
    for g in range(group):
        parts.append(x[:, g * sub:(g + 1) * sub])
        parts.append(y)
    return jnp.concatenate(parts, axis=1)


def _reference(block, x, y):
    """Pure-JAX reference (lax.conv on the real interleaved concat)."""
    x_cat = _build_xcat_ref(x, y, block.group)
    out = lax.conv_general_dilated(
        x_cat, block._w_oihw, window_strides=(1, 1), padding=((1, 1), (1, 1)),
        dimension_numbers=("NCHW", "OIHW", "NCHW"))
    out = out + block.bias.reshape(1, -1, 1, 1)
    return jnp.maximum(out, 0.0)


if __name__ == "__main__":
    key = jax.random.PRNGKey(0)
    k_param, k_x, k_y = jax.random.split(key, 3)

    B, C, H, W = 2, 4, 16, 16
    subchannel = 2                       # group = C // subchannel = 2
    x = jax.random.normal(k_x, (B, C, H, W), jnp.float32)
    y = jax.random.normal(k_y, (B, 1, H, W), jnp.float32)

    block = SCBlockPallas(C, subchannel, k_param)
    out = jax.block_until_ready(block(x, y))
    ref = jax.block_until_ready(_reference(block, x, y))

    assert out.shape == (B, C, H, W)
    assert jnp.allclose(out, ref, atol=1e-4, rtol=1e-4)

    print("KERNEL_OK")
</pallas_src>

<mosaic_0001>
module attributes {stable_mosaic.version = 11 : i64} {
  func.func @_scblock_conv_kernel(%arg0: i32, %arg1: memref<1x4x256xf32, #tpu.memory_space<vmem>>, %arg2: memref<1x1x256xf32, #tpu.memory_space<vmem>>, %arg3: memref<4x72xf32, #tpu.memory_space<vmem>>, %arg4: memref<4x1xf32, #tpu.memory_space<vmem>>, %arg5: memref<1x4x256xf32, #tpu.memory_space<vmem>>, %arg6: memref<5x256xf32, #tpu.memory_space<vmem>>, %arg7: memref<72x256xf32, #tpu.memory_space<vmem>>) attributes {dimension_semantics = [#tpu.dimension_semantics<parallel>], iteration_bounds = array<i64: 2>, scalar_prefetch = 0 : i64, scratch_operands = 2 : i64, tpu.core_type = #tpu.core_type<tc>, window_params = [{transform_indices = @transform_0, window_bounds = array<i64: 1, 4, 256>}, {transform_indices = @transform_1, window_bounds = array<i64: 1, 1, 256>}, {pipeline_mode = #tpu.pipeline_mode<synchronous>, transform_indices = @transform_2, window_bounds = array<i64: 4, 72>}, {pipeline_mode = #tpu.pipeline_mode<synchronous>, transform_indices = @transform_3, window_bounds = array<i64: 4, 1>}, {transform_indices = @transform_4, window_bounds = array<i64: 1, 4, 256>}]} {
    %c0 = arith.constant 0 : index
    %c0_0 = arith.constant 0 : index
    %c0_1 = arith.constant 0 : index
    %0 = vector.load %arg1[%c0, %c0_0, %c0_1] : memref<1x4x256xf32, #tpu.memory_space<vmem>>, vector<1x4x256xf32>
    %1 = vector.shape_cast %0 : vector<1x4x256xf32> to vector<4x256xf32>
    %c0_2 = arith.constant 0 : index
    %c0_3 = arith.constant 0 : index
    %2 = vector.load %arg6[%c0_2, %c0_3] : memref<5x256xf32, #tpu.memory_space<vmem>>, vector<4x256xf32>
    tpu.vector_store %arg6[%c0_2, %c0_3], %1 {strides = array<i32>} : memref<5x256xf32, #tpu.memory_space<vmem>>, vector<4x256xf32>,
    %c0_4 = arith.constant 0 : index
    %c0_5 = arith.constant 0 : index
    %c0_6 = arith.constant 0 : index
    %3 = vector.load %arg2[%c0_4, %c0_5, %c0_6] : memref<1x1x256xf32, #tpu.memory_space<vmem>>, vector<1x1x256xf32>
    %4 = vector.shape_cast %3 : vector<1x1x256xf32> to vector<1x256xf32>
    %c4 = arith.constant 4 : index
    %c0_7 = arith.constant 0 : index
    %5 = vector.load %arg6[%c4, %c0_7] : memref<5x256xf32, #tpu.memory_space<vmem>>, vector<1x256xf32>
    tpu.vector_store %arg6[%c4, %c0_7], %4 {strides = array<i32>} : memref<5x256xf32, #tpu.memory_space<vmem>>, vector<1x256xf32>,
    %c0_8 = arith.constant 0 : index
    %c0_9 = arith.constant 0 : index
    %6 = vector.load %arg6[%c0_8, %c0_9] : memref<5x256xf32, #tpu.memory_space<vmem>>, vector<5x256xf32>
    %7 = tpu.iota {dimensions = array<i32: 1>} : vector<1x256xi32>
    %c255_i32 = arith.constant 255 : i32
    %8 = vector.broadcast %c255_i32 : i32 to vector<1x256xi32>
    %9 = arith.andi %7, %8 : vector<1x256xi32>
    %c4_i32 = arith.constant 4 : i32
    %10 = vector.broadcast %c4_i32 : i32 to vector<1x256xi32>
    %11 = arith.shrsi %9, %10 : vector<1x256xi32>
    %c15_i32 = arith.constant 15 : i32
    %12 = vector.broadcast %c15_i32 : i32 to vector<1x256xi32>
    %13 = arith.andi %7, %12 : vector<1x256xi32>
    %cst = arith.constant 0.000000e+00 : f32
    %14 = vector.broadcast %cst : f32 to vector<72x256xf32>
    %c0_10 = arith.constant 0 : index
    %c0_11 = arith.constant 0 : index
    %15 = vector.load %arg7[%c0_10, %c0_11] : memref<72x256xf32, #tpu.memory_space<vmem>>, vector<72x256xf32>
    tpu.vector_store %arg7[%c0_10, %c0_11], %14 {strides = array<i32>} : memref<72x256xf32, #tpu.memory_space<vmem>>, vector<72x256xf32>,
    %c17_i32 = arith.constant 17 : i32
    %16 = tpu.dynamic_rotate %6 by %c17_i32 dim 1 : vector<5x256xf32>, i32 -> vector<5x256xf32>
    %c-1_i32 = arith.constant -1 : i32
    %17 = vector.broadcast %c-1_i32 : i32 to vector<1x256xi32>
    %18 = arith.addi %11, %17 : vector<1x256xi32>
    %c0_i32 = arith.constant 0 : i32
    %19 = vector.broadcast %c0_i32 : i32 to vector<1x256xi32>
    %20 = arith.cmpi sge, %18, %19 : vector<1x256xi32>
    %c-1_i32_12 = arith.constant -1 : i32
    %21 = vector.broadcast %c-1_i32_12 : i32 to vector<1x256xi32>
    %22 = arith.addi %11, %21 : vector<1x256xi32>
    %c16_i32 = arith.constant 16 : i32
    %23 = vector.broadcast %c16_i32 : i32 to vector<1x256xi32>
    %24 = arith.cmpi slt, %22, %23 : vector<1x256xi32>
    %25 = arith.andi %20, %24 : vector<1x256xi1>
    %c-1_i32_13 = arith.constant -1 : i32
    %26 = vector.broadcast %c-1_i32_13 : i32 to vector<1x256xi32>
    %27 = arith.addi %13, %26 : vector<1x256xi32>
    %c0_i32_14 = arith.constant 0 : i32
    %28 = vector.broadcast %c0_i32_14 : i32 to vector<1x256xi32>
    %29 = arith.cmpi sge, %27, %28 : vector<1x256xi32>
    %30 = arith.andi %25, %29 : vector<1x256xi1>
    %c-1_i32_15 = arith.constant -1 : i32
    %31 = vector.broadcast %c-1_i32_15 : i32 to vector<1x256xi32>
    %32 = arith.addi %13, %31 : vector<1x256xi32>
    %c16_i32_16 = arith.constant 16 : i32
    %33 = vector.broadcast %c16_i32_16 : i32 to vector<1x256xi32>
    %34 = arith.cmpi slt, %32, %33 : vector<1x256xi32>
    %35 = arith.andi %30, %34 : vector<1x256xi1>
    %cst_17 = arith.constant 0.000000e+00 : f32
    %36 = vector.shape_cast %35 : vector<1x256xi1> to vector<1x256xi1>
    %37 = vector.broadcast %36 : vector<1x256xi1> to vector<5x256xi1>
    %38 = vector.broadcast %cst_17 : f32 to vector<5x256xf32>
    %39 = arith.select %37, %16, %38 : vector<5x256xi1>, vector<5x256xf32>
    %c0_18 = arith.constant 0 : index
    %c0_19 = arith.constant 0 : index
    %40 = vector.load %arg7[%c0_18, %c0_19] : memref<72x256xf32, #tpu.memory_space<vmem>>, vector<5x256xf32>
    tpu.vector_store %arg7[%c0_18, %c0_19], %39 {strides = array<i32>} : memref<72x256xf32, #tpu.memory_space<vmem>>, vector<5x256xf32>,
    %c16_i32_20 = arith.constant 16 : i32
    %41 = tpu.dynamic_rotate %6 by %c16_i32_20 dim 1 : vector<5x256xf32>, i32 -> vector<5x256xf32>
    %c-1_i32_21 = arith.constant -1 : i32
    %42 = vector.broadcast %c-1_i32_21 : i32 to vector<1x256xi32>
    %43 = arith.addi %11, %42 : vector<1x256xi32>
    %c0_i32_22 = arith.constant 0 : i32
    %44 = vector.broadcast %c0_i32_22 : i32 to vector<1x256xi32>
    %45 = arith.cmpi sge, %43, %44 : vector<1x256xi32>
    %c-1_i32_23 = arith.constant -1 : i32
    %46 = vector.broadcast %c-1_i32_23 : i32 to vector<1x256xi32>
    %47 = arith.addi %11, %46 : vector<1x256xi32>
    %c16_i32_24 = arith.constant 16 : i32
    %48 = vector.broadcast %c16_i32_24 : i32 to vector<1x256xi32>
    %49 = arith.cmpi slt, %47, %48 : vector<1x256xi32>
    %50 = arith.andi %45, %49 : vector<1x256xi1>
    %c0_i32_25 = arith.constant 0 : i32
    %51 = vector.broadcast %c0_i32_25 : i32 to vector<1x256xi32>
    %52 = arith.addi %13, %51 : vector<1x256xi32>
    %c0_i32_26 = arith.constant 0 : i32
    %53 = vector.broadcast %c0_i32_26 : i32 to vector<1x256xi32>
    %54 = arith.cmpi sge, %52, %53 : vector<1x256xi32>
    %55 = arith.andi %50, %54 : vector<1x256xi1>
    %c0_i32_27 = arith.constant 0 : i32
    %56 = vector.broadcast %c0_i32_27 : i32 to vector<1x256xi32>
    %57 = arith.addi %13, %56 : vector<1x256xi32>
    %c16_i32_28 = arith.constant 16 : i32
    %58 = vector.broadcast %c16_i32_28 : i32 to vector<1x256xi32>
    %59 = arith.cmpi slt, %57, %58 : vector<1x256xi32>
    %60 = arith.andi %55, %59 : vector<1x256xi1>
    %cst_29 = arith.constant 0.000000e+00 : f32
    %61 = vector.shape_cast %60 : vector<1x256xi1> to vector<1x256xi1>
    %62 = vector.broadcast %61 : vector<1x256xi1> to vector<5x256xi1>
    %63 = vector.broadcast %cst_29 : f32 to vector<5x256xf32>
    %64 = arith.select %62, %41, %63 : vector<5x256xi1>, vector<5x256xf32>
    %c8 = arith.constant 8 : index
    %c0_30 = arith.constant 0 : index
    %65 = vector.load %arg7[%c8, %c0_30] : memref<72x256xf32, #tpu.memory_space<vmem>>, vector<5x256xf32>
    tpu.vector_store %arg7[%c8, %c0_30], %64 {strides = array<i32>} : memref<72x256xf32, #tpu.memory_space<vmem>>, vector<5x256xf32>,
    %c15_i32_31 = arith.constant 15 : i32
    %66 = tpu.dynamic_rotate %6 by %c15_i32_31 dim 1 : vector<5x256xf32>, i32 -> vector<5x256xf32>
    %c-1_i32_32 = arith.constant -1 : i32
    %67 = vector.broadcast %c-1_i32_32 : i32 to vector<1x256xi32>
    %68 = arith.addi %11, %67 : vector<1x256xi32>
    %c0_i32_33 = arith.constant 0 : i32
    %69 = vector.broadcast %c0_i32_33 : i32 to vector<1x256xi32>
    %70 = arith.cmpi sge, %68, %69 : vector<1x256xi32>
    %c-1_i32_34 = arith.constant -1 : i32
    %71 = vector.broadcast %c-1_i32_34 : i32 to vector<1x256xi32>
    %72 = arith.addi %11, %71 : vector<1x256xi32>
    %c16_i32_35 = arith.constant 16 : i32
    %73 = vector.broadcast %c16_i32_35 : i32 to vector<1x256xi32>
    %74 = arith.cmpi slt, %72, %73 : vector<1x256xi32>
    %75 = arith.andi %70, %74 : vector<1x256xi1>
    %c1_i32 = arith.constant 1 : i32
    %76 = vector.broadcast %c1_i32 : i32 to vector<1x256xi32>
    %77 = arith.addi %13, %76 : vector<1x256xi32>
    %c0_i32_36 = arith.constant 0 : i32
    %78 = vector.broadcast %c0_i32_36 : i32 to vector<1x256xi32>
    %79 = arith.cmpi sge, %77, %78 : vector<1x256xi32>
    %80 = arith.andi %75, %79 : vector<1x256xi1>
    %c1_i32_37 = arith.constant 1 : i32
    %81 = vector.broadcast %c1_i32_37 : i32 to vector<1x256xi32>
    %82 = arith.addi %13, %81 : vector<1x256xi32>
    %c16_i32_38 = arith.constant 16 : i32
    %83 = vector.broadcast %c16_i32_38 : i32 to vector<1x256xi32>
    %84 = arith.cmpi slt, %82, %83 : vector<1x256xi32>
    %85 = arith.andi %80, %84 : vector<1x256xi1>
    %cst_39 = arith.constant 0.000000e+00 : f32
    %86 = vector.shape_cast %85 : vector<1x256xi1> to vector<1x256xi1>
    %87 = vector.broadcast %86 : vector<1x256xi1> to vector<5x256xi1>
    %88 = vector.broadcast %cst_39 : f32 to vector<5x256xf32>
    %89 = arith.select %87, %66, %88 : vector<5x256xi1>, vector<5x256xf32>
    %c16 = arith.constant 16 : index
    %c0_40 = arith.constant 0 : index
    %90 = vector.load %arg7[%c16, %c0_40] : memref<72x256xf32, #tpu.memory_space<vmem>>, vector<5x256xf32>
    tpu.vector_store %arg7[%c16, %c0_40], %89 {strides = array<i32>} : memref<72x256xf32, #tpu.memory_space<vmem>>, vector<5x256xf32>,
    %c1_i32_41 = arith.constant 1 : i32
    %91 = tpu.dynamic_rotate %6 by %c1_i32_41 dim 1 : vector<5x256xf32>, i32 -> vector<5x256xf32>
    %c0_i32_42 = arith.constant 0 : i32
    %92 = vector.broadcast %c0_i32_42 : i32 to vector<1x256xi32>
    %93 = arith.addi %11, %92 : vector<1x256xi32>
    %c0_i32_43 = arith.constant 0 : i32
    %94 = vector.broadcast %c0_i32_43 : i32 to vector<1x256xi32>
    %95 = arith.cmpi sge, %93, %94 : vector<1x256xi32>
    %c0_i32_44 = arith.constant 0 : i32
    %96 = vector.broadcast %c0_i32_44 : i32 to vector<1x256xi32>
    %97 = arith.addi %11, %96 : vector<1x256xi32>
    %c16_i32_45 = arith.constant 16 : i32
    %98 = vector.broadcast %c16_i32_45 : i32 to vector<1x256xi32>
    %99 = arith.cmpi slt, %97, %98 : vector<1x256xi32>
    %100 = arith.andi %95, %99 : vector<1x256xi1>
    %c-1_i32_46 = arith.constant -1 : i32
    %101 = vector.broadcast %c-1_i32_46 : i32 to vector<1x256xi32>
    %102 = arith.addi %13, %101 : vector<1x256xi32>
    %c0_i32_47 = arith.constant 0 : i32
    %103 = vector.broadcast %c0_i32_47 : i32 to vector<1x256xi32>
    %104 = arith.cmpi sge, %102, %103 : vector<1x256xi32>
    %105 = arith.andi %100, %104 : vector<1x256xi1>
    %c-1_i32_48 = arith.constant -1 : i32
    %106 = vector.broadcast %c-1_i32_48 : i32 to vector<1x256xi32>
    %107 = arith.addi %13, %106 : vector<1x256xi32>
    %c16_i32_49 = arith.constant 16 : i32
    %108 = vector.broadcast %c16_i32_49 : i32 to vector<1x256xi32>
    %109 = arith.cmpi slt, %107, %108 : vector<1x256xi32>
    %110 = arith.andi %105, %109 : vector<1x256xi1>
    %cst_50 = arith.constant 0.000000e+00 : f32
    %111 = vector.shape_cast %110 : vector<1x256xi1> to vector<1x256xi1>
    %112 = vector.broadcast %111 : vector<1x256xi1> to vector<5x256xi1>
    %113 = vector.broadcast %cst_50 : f32 to vector<5x256xf32>
    %114 = arith.select %112, %91, %113 : vector<5x256xi1>, vector<5x256xf32>
    %c24 = arith.constant 24 : index
    %c0_51 = arith.constant 0 : index
    %115 = vector.load %arg7[%c24, %c0_51] : memref<72x256xf32, #tpu.memory_space<vmem>>, vector<5x256xf32>
    tpu.vector_store %arg7[%c24, %c0_51], %114 {strides = array<i32>} : memref<72x256xf32, #tpu.memory_space<vmem>>, vector<5x256xf32>,
    %c0_i32_52 = arith.constant 0 : i32
    %116 = vector.broadcast %c0_i32_52 : i32 to vector<1x256xi32>
    %117 = arith.addi %11, %116 : vector<1x256xi32>
    %c0_i32_53 = arith.constant 0 : i32
    %118 = vector.broadcast %c0_i32_53 : i32 to vector<1x256xi32>
    %119 = arith.cmpi sge, %117, %118 : vector<1x256xi32>
    %c0_i32_54 = arith.constant 0 : i32
    %120 = vector.broadcast %c0_i32_54 : i32 to vector<1x256xi32>
    %121 = arith.addi %11, %120 : vector<1x256xi32>
    %c16_i32_55 = arith.constant 16 : i32
    %122 = vector.broadcast %c16_i32_55 : i32 to vector<1x256xi32>
    %123 = arith.cmpi slt, %121, %122 : vector<1x256xi32>
    %124 = arith.andi %119, %123 : vector<1x256xi1>
    %c0_i32_56 = arith.constant 0 : i32
    %125 = vector.broadcast %c0_i32_56 : i32 to vector<1x256xi32>
    %126 = arith.addi %13, %125 : vector<1x256xi32>
    %c0_i32_57 = arith.constant 0 : i32
    %127 = vector.broadcast %c0_i32_57 : i32 to vector<1x256xi32>
    %128 = arith.cmpi sge, %126, %127 : vector<1x256xi32>
    %129 = arith.andi %124, %128 : vector<1x256xi1>
    %c0_i32_58 = arith.constant 0 : i32
    %130 = vector.broadcast %c0_i32_58 : i32 to vector<1x256xi32>
    %131 = arith.addi %13, %130 : vector<1x256xi32>
    %c16_i32_59 = arith.constant 16 : i32
    %132 = vector.broadcast %c16_i32_59 : i32 to vector<1x256xi32>
    %133 = arith.cmpi slt, %131, %132 : vector<1x256xi32>
    %134 = arith.andi %129, %133 : vector<1x256xi1>
    %cst_60 = arith.constant 0.000000e+00 : f32
    %135 = vector.shape_cast %134 : vector<1x256xi1> to vector<1x256xi1>
    %136 = vector.broadcast %135 : vector<1x256xi1> to vector<5x256xi1>
    %137 = vector.broadcast %cst_60 : f32 to vector<5x256xf32>
    %138 = arith.select %136, %6, %137 : vector<5x256xi1>, vector<5x256xf32>
    %c32 = arith.constant 32 : index
    %c0_61 = arith.constant 0 : index
    %139 = vector.load %arg7[%c32, %c0_61] : memref<72x256xf32, #tpu.memory_space<vmem>>, vector<5x256xf32>
    tpu.vector_store %arg7[%c32, %c0_61], %138 {strides = array<i32>} : memref<72x256xf32, #tpu.memory_space<vmem>>, vector<5x256xf32>,
    %c255_i32_62 = arith.constant 255 : i32
    %140 = tpu.dynamic_rotate %6 by %c255_i32_62 dim 1 : vector<5x256xf32>, i32 -> vector<5x256xf32>
    %c0_i32_63 = arith.constant 0 : i32
    %141 = vector.broadcast %c0_i32_63 : i32 to vector<1x256xi32>
    %142 = arith.addi %11, %141 : vector<1x256xi32>
    %c0_i32_64 = arith.constant 0 : i32
    %143 = vector.broadcast %c0_i32_64 : i32 to vector<1x256xi32>
    %144 = arith.cmpi sge, %142, %143 : vector<1x256xi32>
    %c0_i32_65 = arith.constant 0 : i32
    %145 = vector.broadcast %c0_i32_65 : i32 to vector<1x256xi32>
    %146 = arith.addi %11, %145 : vector<1x256xi32>
    %c16_i32_66 = arith.constant 16 : i32
    %147 = vector.broadcast %c16_i32_66 : i32 to vector<1x256xi32>
    %148 = arith.cmpi slt, %146, %147 : vector<1x256xi32>
    %149 = arith.andi %144, %148 : vector<1x256xi1>
    %c1_i32_67 = arith.constant 1 : i32
    %150 = vector.broadcast %c1_i32_67 : i32 to vector<1x256xi32>
    %151 = arith.addi %13, %150 : vector<1x256xi32>
    %c0_i32_68 = arith.constant 0 : i32
    %152 = vector.broadcast %c0_i32_68 : i32 to vector<1x256xi32>
    %153 = arith.cmpi sge, %151, %152 : vector<1x256xi32>
    %154 = arith.andi %149, %153 : vector<1x256xi1>
    %c1_i32_69 = arith.constant 1 : i32
    %155 = vector.broadcast %c1_i32_69 : i32 to vector<1x256xi32>
    %156 = arith.addi %13, %155 : vector<1x256xi32>
    %c16_i32_70 = arith.constant 16 : i32
    %157 = vector.broadcast %c16_i32_70 : i32 to vector<1x256xi32>
    %158 = arith.cmpi slt, %156, %157 : vector<1x256xi32>
    %159 = arith.andi %154, %158 : vector<1x256xi1>
    %cst_71 = arith.constant 0.000000e+00 : f32
    %160 = vector.shape_cast %159 : vector<1x256xi1> to vector<1x256xi1>
    %161 = vector.broadcast %160 : vector<1x256xi1> to vector<5x256xi1>
    %162 = vector.broadcast %cst_71 : f32 to vector<5x256xf32>
    %163 = arith.select %161, %140, %162 : vector<5x256xi1>, vector<5x256xf32>
    %c40 = arith.constant 40 : index
    %c0_72 = arith.constant 0 : index
    %164 = vector.load %arg7[%c40, %c0_72] : memref<72x256xf32, #tpu.memory_space<vmem>>, vector<5x256xf32>
    tpu.vector_store %arg7[%c40, %c0_72], %163 {strides = array<i32>} : memref<72x256xf32, #tpu.memory_space<vmem>>, vector<5x256xf32>,
    %c241_i32 = arith.constant 241 : i32
    %165 = tpu.dynamic_rotate %6 by %c241_i32 dim 1 : vector<5x256xf32>, i32 -> vector<5x256xf32>
    %c1_i32_73 = arith.constant 1 : i32
    %166 = vector.broadcast %c1_i32_73 : i32 to vector<1x256xi32>
    %167 = arith.addi %11, %166 : vector<1x256xi32>
    %c0_i32_74 = arith.constant 0 : i32
    %168 = vector.broadcast %c0_i32_74 : i32 to vector<1x256xi32>
    %169 = arith.cmpi sge, %167, %168 : vector<1x256xi32>
    %c1_i32_75 = arith.constant 1 : i32
    %170 = vector.broadcast %c1_i32_75 : i32 to vector<1x256xi32>
    %171 = arith.addi %11, %170 : vector<1x256xi32>
    %c16_i32_76 = arith.constant 16 : i32
    %172 = vector.broadcast %c16_i32_76 : i32 to vector<1x256xi32>
    %173 = arith.cmpi slt, %171, %172 : vector<1x256xi32>
    %174 = arith.andi %169, %173 : vector<1x256xi1>
    %c-1_i32_77 = arith.constant -1 : i32
    %175 = vector.broadcast %c-1_i32_77 : i32 to vector<1x256xi32>
    %176 = arith.addi %13, %175 : vector<1x256xi32>
    %c0_i32_78 = arith.constant 0 : i32
    %177 = vector.broadcast %c0_i32_78 : i32 to vector<1x256xi32>
    %178 = arith.cmpi sge, %176, %177 : vector<1x256xi32>
    %179 = arith.andi %174, %178 : vector<1x256xi1>
    %c-1_i32_79 = arith.constant -1 : i32
    %180 = vector.broadcast %c-1_i32_79 : i32 to vector<1x256xi32>
    %181 = arith.addi %13, %180 : vector<1x256xi32>
    %c16_i32_80 = arith.constant 16 : i32
    %182 = vector.broadcast %c16_i32_80 : i32 to vector<1x256xi32>
    %183 = arith.cmpi slt, %181, %182 : vector<1x256xi32>
    %184 = arith.andi %179, %183 : vector<1x256xi1>
    %cst_81 = arith.constant 0.000000e+00 : f32
    %185 = vector.shape_cast %184 : vector<1x256xi1> to vector<1x256xi1>
    %186 = vector.broadcast %185 : vector<1x256xi1> to vector<5x256xi1>
    %187 = vector.broadcast %cst_81 : f32 to vector<5x256xf32>
    %188 = arith.select %186, %165, %187 : vector<5x256xi1>, vector<5x256xf32>
    %c48 = arith.constant 48 : index
    %c0_82 = arith.constant 0 : index
    %189 = vector.load %arg7[%c48, %c0_82] : memref<72x256xf32, #tpu.memory_space<vmem>>, vector<5x256xf32>
    tpu.vector_store %arg7[%c48, %c0_82], %188 {strides = array<i32>} : memref<72x256xf32, #tpu.memory_space<vmem>>, vector<5x256xf32>,
    %c240_i32 = arith.constant 240 : i32
    %190 = tpu.dynamic_rotate %6 by %c240_i32 dim 1 : vector<5x256xf32>, i32 -> vector<5x256xf32>
    %c1_i32_83 = arith.constant 1 : i32
    %191 = vector.broadcast %c1_i32_83 : i32 to vector<1x256xi32>
    %192 = arith.addi %11, %191 : vector<1x256xi32>
    %c0_i32_84 = arith.constant 0 : i32
    %193 = vector.broadcast %c0_i32_84 : i32 to vector<1x256xi32>
    %194 = arith.cmpi sge, %192, %193 : vector<1x256xi32>
    %c1_i32_85 = arith.constant 1 : i32
    %195 = vector.broadcast %c1_i32_85 : i32 to vector<1x256xi32>
    %196 = arith.addi %11, %195 : vector<1x256xi32>
    %c16_i32_86 = arith.constant 16 : i32
    %197 = vector.broadcast %c16_i32_86 : i32 to vector<1x256xi32>
    %198 = arith.cmpi slt, %196, %197 : vector<1x256xi32>
    %199 = arith.andi %194, %198 : vector<1x256xi1>
    %c0_i32_87 = arith.constant 0 : i32
    %200 = vector.broadcast %c0_i32_87 : i32 to vector<1x256xi32>
    %201 = arith.addi %13, %200 : vector<1x256xi32>
    %c0_i32_88 = arith.constant 0 : i32
    %202 = vector.broadcast %c0_i32_88 : i32 to vector<1x256xi32>
    %203 = arith.cmpi sge, %201, %202 : vector<1x256xi32>
    %204 = arith.andi %199, %203 : vector<1x256xi1>
    %c0_i32_89 = arith.constant 0 : i32
    %205 = vector.broadcast %c0_i32_89 : i32 to vector<1x256xi32>
    %206 = arith.addi %13, %205 : vector<1x256xi32>
    %c16_i32_90 = arith.constant 16 : i32
    %207 = vector.broadcast %c16_i32_90 : i32 to vector<1x256xi32>
    %208 = arith.cmpi slt, %206, %207 : vector<1x256xi32>
    %209 = arith.andi %204, %208 : vector<1x256xi1>
    %cst_91 = arith.constant 0.000000e+00 : f32
    %210 = vector.shape_cast %209 : vector<1x256xi1> to vector<1x256xi1>
    %211 = vector.broadcast %210 : vector<1x256xi1> to vector<5x256xi1>
    %212 = vector.broadcast %cst_91 : f32 to vector<5x256xf32>
    %213 = arith.select %211, %190, %212 : vector<5x256xi1>, vector<5x256xf32>
    %c56 = arith.constant 56 : index
    %c0_92 = arith.constant 0 : index
    %214 = vector.load %arg7[%c56, %c0_92] : memref<72x256xf32, #tpu.memory_space<vmem>>, vector<5x256xf32>
    tpu.vector_store %arg7[%c56, %c0_92], %213 {strides = array<i32>} : memref<72x256xf32, #tpu.memory_space<vmem>>, vector<5x256xf32>,
    %c239_i32 = arith.constant 239 : i32
    %215 = tpu.dynamic_rotate %6 by %c239_i32 dim 1 : vector<5x256xf32>, i32 -> vector<5x256xf32>
    %c1_i32_93 = arith.constant 1 : i32
    %216 = vector.broadcast %c1_i32_93 : i32 to vector<1x256xi32>
    %217 = arith.addi %11, %216 : vector<1x256xi32>
    %c0_i32_94 = arith.constant 0 : i32
    %218 = vector.broadcast %c0_i32_94 : i32 to vector<1x256xi32>
    %219 = arith.cmpi sge, %217, %218 : vector<1x256xi32>
    %c1_i32_95 = arith.constant 1 : i32
    %220 = vector.broadcast %c1_i32_95 : i32 to vector<1x256xi32>
    %221 = arith.addi %11, %220 : vector<1x256xi32>
    %c16_i32_96 = arith.constant 16 : i32
    %222 = vector.broadcast %c16_i32_96 : i32 to vector<1x256xi32>
    %223 = arith.cmpi slt, %221, %222 : vector<1x256xi32>
    %224 = arith.andi %219, %223 : vector<1x256xi1>
    %c1_i32_97 = arith.constant 1 : i32
    %225 = vector.broadcast %c1_i32_97 : i32 to vector<1x256xi32>
    %226 = arith.addi %13, %225 : vector<1x256xi32>
    %c0_i32_98 = arith.constant 0 : i32
    %227 = vector.broadcast %c0_i32_98 : i32 to vector<1x256xi32>
    %228 = arith.cmpi sge, %226, %227 : vector<1x256xi32>
    %229 = arith.andi %224, %228 : vector<1x256xi1>
    %c1_i32_99 = arith.constant 1 : i32
    %230 = vector.broadcast %c1_i32_99 : i32 to vector<1x256xi32>
    %231 = arith.addi %13, %230 : vector<1x256xi32>
    %c16_i32_100 = arith.constant 16 : i32
    %232 = vector.broadcast %c16_i32_100 : i32 to vector<1x256xi32>
    %233 = arith.cmpi slt, %231, %232 : vector<1x256xi32>
    %234 = arith.andi %229, %233 : vector<1x256xi1>
    %cst_101 = arith.constant 0.000000e+00 : f32
    %235 = vector.shape_cast %234 : vector<1x256xi1> to vector<1x256xi1>
    %236 = vector.broadcast %235 : vector<1x256xi1> to vector<5x256xi1>
    %237 = vector.broadcast %cst_101 : f32 to vector<5x256xf32>
    %238 = arith.select %236, %215, %237 : vector<5x256xi1>, vector<5x256xf32>
    %c64 = arith.constant 64 : index
    %c0_102 = arith.constant 0 : index
    %239 = vector.load %arg7[%c64, %c0_102] : memref<72x256xf32, #tpu.memory_space<vmem>>, vector<5x256xf32>
    tpu.vector_store %arg7[%c64, %c0_102], %238 {strides = array<i32>} : memref<72x256xf32, #tpu.memory_space<vmem>>, vector<5x256xf32>,
    %c0_103 = arith.constant 0 : index
    %c0_104 = arith.constant 0 : index
    %240 = vector.load %arg3[%c0_103, %c0_104] : memref<4x72xf32, #tpu.memory_space<vmem>>, vector<4x72xf32>
    %c0_105 = arith.constant 0 : index
    %c0_106 = arith.constant 0 : index
    %241 = vector.load %arg7[%c0_105, %c0_106] : memref<72x256xf32, #tpu.memory_space<vmem>>, vector<72x256xf32>
    %cst_107 = arith.constant dense<0.000000e+00> : vector<4x256xf32>
    %242 = tpu.matmul %240, %241, %cst_107 {dimension_numbers = #tpu.dot_dimension_numbers<[1], [0], [0], [1], [0, 0, 1, 1], [], []>} : vector<4x72xf32>, vector<72x256xf32>, vector<4x256xf32> -> vector<4x256xf32>
    %c0_108 = arith.constant 0 : index
    %c0_109 = arith.constant 0 : index
    %243 = vector.load %arg4[%c0_108, %c0_109] : memref<4x1xf32, #tpu.memory_space<vmem>>, vector<4x1xf32>
    %244 = vector.broadcast %243 : vector<4x1xf32> to vector<4x256xf32>
    %245 = arith.addf %242, %244 : vector<4x256xf32>
    %cst_110 = arith.constant 0.000000e+00 : f32
    %246 = vector.broadcast %cst_110 : f32 to vector<4x256xf32>
    %247 = arith.maximumf %245, %246 : vector<4x256xf32>
    %c0_111 = arith.constant 0 : index
    %c0_112 = arith.constant 0 : index
    %c0_113 = arith.constant 0 : index
    %248 = vector.load %arg5[%c0_111, %c0_112, %c0_113] : memref<1x4x256xf32, #tpu.memory_space<vmem>>, vector<1x4x256xf32>
    %249 = vector.shape_cast %248 : vector<1x4x256xf32> to vector<4x256xf32>
    %250 = vector.shape_cast %247 : vector<4x256xf32> to vector<1x4x256xf32>
    tpu.vector_store %arg5[%c0_111, %c0_112, %c0_113], %250 {strides = array<i32>} : memref<1x4x256xf32, #tpu.memory_space<vmem>>, vector<1x4x256xf32>,
    return
  }
  func.func @transform_0(%arg0: i32) -> (i32, i32, i32) {
    %c0_i32 = arith.constant 0 : i32
    %c0_i32_0 = arith.constant 0 : i32
    %c0_i32_1 = arith.constant 0 : i32
    return %arg0, %c0_i32, %c0_i32_0 : i32, i32, i32
  }
  func.func @transform_1(%arg0: i32) -> (i32, i32, i32) {
    %c0_i32 = arith.constant 0 : i32
    %c0_i32_0 = arith.constant 0 : i32
    %c0_i32_1 = arith.constant 0 : i32
    return %arg0, %c0_i32, %c0_i32_0 : i32, i32, i32
  }
  func.func @transform_2(%arg0: i32) -> (i32, i32) {
    %c0_i32 = arith.constant 0 : i32
    %c0_i32_0 = arith.constant 0 : i32
    %c0_i32_1 = arith.constant 0 : i32
    return %c0_i32, %c0_i32_0 : i32, i32
  }
  func.func @transform_3(%arg0: i32) -> (i32, i32) {
    %c0_i32 = arith.constant 0 : i32
    %c0_i32_0 = arith.constant 0 : i32
    %c0_i32_1 = arith.constant 0 : i32
    return %c0_i32, %c0_i32_0 : i32, i32
  }
  func.func @transform_4(%arg0: i32) -> (i32, i32, i32) {
    %c0_i32 = arith.constant 0 : i32
    %c0_i32_0 = arith.constant 0 : i32
    %c0_i32_1 = arith.constant 0 : i32
    return %arg0, %c0_i32, %c0_i32_0 : i32, i32, i32
  }
}

</mosaic_0001>

<bundles_post_ra>
// kernel: tpu_custom_call.1
= control target key start
LH: loop header
LB: loop body
LE: loop exit
PB: predicated region body
PF: predicated region fallthrough
CT: control target
= control target key end

     0   :  { %9 = vsyncpa [#allocation5], 0  ;;  %s1266_s0 = inlined_call_operand.hbm [shape: f32[2,4,256], index: 0, kind: input, shape index: {}]   ;;  %s1267_s1 = inlined_call_operand.vmem [shape: f32[2,1,256], index: 1, kind: input, shape index: {}]   ;;  %s1268_s2 = inlined_call_operand.hbm [shape: f32[4,72], index: 2, kind: input, shape index: {}]   ;;  %s1269_s3 = inlined_call_operand.vmem [shape: f32[4,1], index: 3, kind: input, shape index: {}]   ;;  %s1270_s4 = inlined_call_operand.hbm [shape: f32[2,4,256], index: 4, kind: output, shape index: {}]  }
   0x1   :  { %11 = vsyncpa [#allocation5 + $0x1], 0 }
   0x2   :  { %12 = vsyncpa [#allocation8], 0 }
   0x3   :  { %13 = vsyncpa [#allocation6], 0 }
   0x4   :  { %15 = vsyncpa [#allocation6 + $0x1], 0  ;;  %s941_s15 = smov 0   ;;  %s943_s16 = smov 0  }
   0x5   :  { %s945_s17 = smov 0   ;;  %s947_s18 = smov 0  }
   0x6 LB: > { %s962_s19 = sadd.s32 4294967295, %s903_s18   ;;  %s683_s20 = sadd.s32 4294967294, %s903_s18   ;;  %s903_s18 = sphi %s947_s18, %s1304_s18   ;;  %s899_s17 = sphi %s945_s17, %s1303_s17   ;;  %s895_s16 = sphi %s943_s16, %s1302_s16   ;;  %s891_s15 = sphi %s941_s15, %s1301_s15  }
   0x7   : > { %p41_p0 = scmp.ne.s32.totalorder %s895_s16, %s891_s15  ;;  %p42_p1 = scmp.eq.s32.totalorder %s962_s19, 0 }
   0x8   : > { %p133_p2 = scmp.eq.s32.totalorder %s962_s19, 1  ;;  %p139_p3 = scmp.eq.s32.totalorder %s683_s20, 1 }
   0x9   : > { %p971_p4 = por %p42_p1, %p41_p0  ;;  %p684_p5 = scmp.ge.s32.totalorder %s903_s18, 1 }
   0xa   : > { %p976_p6 = por %p139_p3, %p41_p0  ;;  %p146_p7 = scmp.lt.s32.totalorder %s903_s18, 3 }
   0xb   : > { %s158_s25 = sshll.u32 %s1268_s2, 4  ;;  %s905_s27 = smov [#allocation7]   ;;  %s159_s25 = int_to_ptr.hbm [resolvable:$true] %s158_s25 }
   0xc   : > { %p984_p8 = pnand %p684_p5, %p146_p7  ;;  %s160_s28 = sshll.u32 %s905_s27, 4  ;;  %s161_s28 = int_to_ptr.vmem [resolvable:$true] %s160_s28 }
   0xd   : > { %s994_s29 = sadd.s32 1, %s903_s18   ;;  %s28_s30 = sadd.s32 1, %s899_s17 }
   0xe   : > { %p712_p10 = pneg %p984_p8  ;;  %s25_s5 = ssub.s32 %s903_s18, %s994_s29 }
   0xf   : > { %p26_p12 = scmp.eq.s32.totalorder %s25_s5, 0  ;;  %p35_p13 = scmp.ne.s32.totalorder %s899_s17, %s895_s16 }
  0x10   : > { %p713_p11 = pnand %p712_p10, %p42_p1  ;;  %p36_p0 = scmp.eq.s32.totalorder %s903_s18, 0 }
  0x11   : > { %s1003_s6 = scalar_select %p26_p12, %s899_s17, %s28_s30  }
  0x12   : > { %715 = dma.hbm_to_vmem [thread:$0]  (!%p713_p11), %s159_s25, 64, %s161_s28, [#allocation8]  }
  0x13   : > { %p1007_p3 = por %p133_p2, %p35_p13  ;;  %p725_p5 = scmp.lt.s32.totalorder %s903_s18, 2 }
  0x14   : > { %s174_s8 = sand.u32 1, %s899_s17   ;;  %s702_s9 = sshll.u32 %s903_s18, 3 }
  0x15   : > { %p37_p7 = por %p36_p0, %p35_p13  ;;  %s687_s10 = sshll.u32 %s174_s8, 3 }
  0x16   : > { %s183_s13 = scalar_lea.hbm %s1266_s0, %s702_s9  ;;  %s178_s20 = scalar_lea.vmem [#allocation4], %s687_s10 }
  0x17   : > { %s185_s14 = sshll.u32 %s183_s13, 4  ;;  %s187_s23 = sshll.u32 %s178_s20, 4  ;;  %s186_s14 = int_to_ptr.hbm [resolvable:$true] %s185_s14  ;;  %s188_s23 = int_to_ptr.vmem [resolvable:$true] %s187_s23 }
  0x18   : > { %p1017_p10 = pnand %p725_p5, %p37_p7  ;;  %s175_s25 = scalar_lea.sflag [#allocation5], %s174_s8 }
  0x19   : > { %s803_s27 = sshra.s32 %s186_s14, 4  ;;  %s810_s9 = scalar_lea.hbm %s1266_s0, 16  ;;  %s804_s27 = int_to_ptr.hbm [resolvable:$true] %s803_s27 }
  0x1a   : > { %s805_s28 = scalar_lea.hbm %s804_s27, 8  ;;  %p807_p11 = pneg %p1017_p10 }
  0x1b   : > { %p806_p2 = scmp.ne.s32.totalorder %s804_s27, %s805_s28  ;;  %p811_p0 = scmp.lt.s32.totalorder %s804_s27, %s1266_s0 }
  0x1c   : > { %p812_p5 = scmp.lt.s32.totalorder %s810_s9, %s805_s28 }
  0x1d   : > { %p808_p12 = pnand %p807_p11, %p806_p2 }
  0x1e   : > { %p813_p7 = por %p812_p5, %p811_p0 }
  0x1f   : > { %p809_p13 = pneg %p808_p12 }
  0x21   : > { %p814_p9 = pnand %p813_p7, %p809_p13 }
  0x23   : > { %817 = shalt.err (!%p814_p9)
}
  0x24   : > { %719 = dma.hbm_to_vmem [thread:$0]  (!%p1017_p10), %s186_s14, 128, %s188_s23, %s175_s25  }
  0x25   : > { %203 = sbr.rel (%p984_p8) target bundleno = 365 (0x16d), region = 36  ;;  %s1034_s8 = sand.u32 (!%p984_p8), 1, %s895_s16  }
  0x26   : > { %s691_s12 = sshll.u32 (!%p984_p8), %s1034_s8, 3  ;;  %s206_s13 = scalar_lea.sflag (!%p984_p8), [#allocation5], %s1034_s8 }
  0x27   : > { %s209_s20 = scalar_lea.vmem (!%p984_p8), [#allocation4], %s691_s12 }
  0x2a   : > { %878 = dma.done.wait (%p971_p4), %s206_s13, 128  }
  0x2b   : > { %880 = vsyncadd (%p971_p4), %s206_s13, 4294967168 }
  0x2c   : > { %882 = dma.done.wait (%p42_p1), [#allocation8], 64  }
  0x2d   : > { %884 = vsyncadd (%p42_p1), [#allocation8], 4294967232  ;;  %p244_p8 = scmp.lt.s32.totalorder %s962_s19, 1  ;;  %v258_v0 = vlaneseq  ;;  %v248_v1 = vld [vmem:[%s209_s20] sm:$0xff]  ;;  %s906_s21 = smov 112   ;;  %v914_v11 = vmov 0.0  }
  0x2e   : > { %250 = vst [vmem:[#allocation1] ss:$2 sm:$0xff] %v248_v1  ;;  %s907_s27 = smov 111   ;;  %s908_s28 = smov 113   ;;  %v515_v62 = vld [vmem:[%s1269_s3] sm:$0xf] }
  0x2f   : > { %s245_s26 = scalar_select %p244_p8, %s962_s19, 1  ;;  %vm260_vm0 = vcmp.lt.s32.totalorder %v258_v0, 256  ;;  %v1073_v7 = vand.u32 127, %v258_v0  ;;  %288 = vst [vmem:[#allocation3 + $0x10] sm:$0xff] %v914_v11 }
  0x30   : > { %s909_s30 = smov 127   ;;  %s910_s5 = smov 1   ;;  %289 = vst [vmem:[#allocation3 + $0x48] sm:$0xff] %v914_v11 }
  0x31   : > { %s694_s14 = sshll.u32 %s245_s26, 1  ;;  %s911_s9 = smov 15   ;;  %v269_v8 = vadd.s32 128, %v1073_v7  ;;  %v270_v9 = vand.u32 255, %v1073_v7  ;;  %276 = vst [vmem:[#allocation3] sm:$0xff] %v914_v11  ;;  %v274_v14 = vand.u32 15, %v1073_v7 }
  0x32   : > { %s247_s25 = scalar_lea.vmem %s1267_s1, %s694_s14  ;;  %s912_s10 = smov 16   ;;  %277 = vst [vmem:[#allocation3 + $0x38] sm:$0xff] %v914_v11  ;;  %vm435_vm9 = vcmp.lt.s32.totalorder %v1073_v7, 113 }
  0x33   : > { %v257_v2 = vld [vmem:[%s247_s25] sm:$0x3]  ;;  %s913_s11 = smov 17   ;;  %v271_v10 = vand.u32 255, %v269_v8  ;;  %v1077_v12 = vshra.s32 %v270_v9, 4  ;;  %v275_v15 = vand.u32 15, %v269_v8 }
  0x34   : > { %263 = vst.msk [vmem:[#allocation2 + $0x4] ss:$8 sm:$0x3] %vm260_vm0, %v257_v2  ;;  %v1084_v18 = vadd.s32 4294967295, %v274_v14  ;;  %v357_v36 = vadd.s32 1, %v274_v14  ;;  %v915_v2 = vmov 0  }
  0x35   : > { %v251_v3 = vld.sshfl [vmem:[#allocation1] sm:$0xff pattern:$0x75316420]  ;;  %v252_v4 = vld.sshfl [vmem:[#allocation1 + $0x8] sm:$0xff pattern:$0x75316420]  ;;  %771 = vset.pattern.permute.xlu1 %v915_v2  ;;  %772 = vset.pattern.permute.xlu0 %v915_v2 }
  0x36   : > { %255 = vst [vmem:[#allocation2] sm:$0xf] %v251_v3  ;;  %v1079_v13 = vshra.s32 %v271_v10, 4  ;;  %v438_v16 = vadd.s32 1, %v1077_v12  ;;  %v1086_v20 = vadd.s32 4294967295, %v275_v15  ;;  %vm311_vm5 = vcmp.ge.s32.totalorder %v1084_v18, 0 }
  0x37   : > { %256 = vst [vmem:[#allocation2 + $0x8] sm:$0xf] %v252_v4  ;;  %vm382_vm12 = vcmp.ge.s32.totalorder %v1077_v12, 0  ;;  %vm384_vm14 = vcmp.lt.s32.totalorder %v1077_v12, 16  ;;  %v358_v37 = vadd.s32 1, %v275_v15  ;;  %v301_v49 = vadd.s32 4294967295, %v1077_v12 }
  0x38   : > { %278 = vst [vmem:[#allocation3 + $0x78] sm:$0xff] %v914_v11  ;;  %v439_v17 = vadd.s32 1, %v1079_v13  ;;  %vm440_vm1 = vcmp.ge.s32.totalorder %v438_v16, 0  ;;  %vm442_vm2 = vcmp.lt.s32.totalorder %v438_v16, 16  ;;  %vm312_vm7 = vcmp.ge.s32.totalorder %v1086_v20, 0  ;;  %vm1119_vm0 = vmand %vm382_vm12, %vm384_vm14  ;;  %s703_s26 = sshll.u32 %s962_s19, 3 }
  0x39   : > { %279 = vst [vmem:[#allocation3 + $0x58] sm:$0xff] %v914_v11  ;;  %vm1089_vm6 = vmand %vm440_vm1, %vm442_vm2  ;;  %vm383_vm13 = vcmp.ge.s32.totalorder %v1079_v13, 0  ;;  %vm385_vm15 = vcmp.lt.s32.totalorder %v1079_v13, 16  ;;  %vm363_vm2 = vcmp.lt.s32.totalorder %v357_v36, 16  ;;  %vm416_vm12 = vcmp.lt.s32.totalorder %v1073_v7, 127  ;;  %s586_s24 = scalar_lea.hbm %s1270_s4, %s703_s26  ;;  %s243_s25 = scalar_lea.vmem [#allocation9], %s691_s12 }
  0x3a   : > { %280 = vst [vmem:[#allocation3 + $0x20] sm:$0xff] %v914_v11  ;;  %vm441_vm3 = vcmp.ge.s32.totalorder %v439_v17, 0  ;;  %vm443_vm4 = vcmp.lt.s32.totalorder %v439_v17, 16  ;;  %vm1103_vm10 = vmand %vm1089_vm6, %vm311_vm5  ;;  %v302_v50 = vadd.s32 4294967295, %v1079_v13  ;;  %vm305_vm14 = vcmp.lt.s32.totalorder %v301_v49, 16  ;;  %s575_s19 = scalar_lea.sflag [#allocation6], %s1034_s8 }
  0x3b   : > { %281 = vst [vmem:[#allocation3 + $0x8] sm:$0xff] %v914_v11  ;;  %vm1094_vm8 = vmand %vm441_vm3, %vm443_vm4  ;;  %vm364_vm3 = vcmp.lt.s32.totalorder %v358_v37, 16  ;;  %vm462_vm4 = vcmp.lt.s32.totalorder %v1073_v7, 112  ;;  %v496_v18 = vld [vmem:[#allocation7] sm:$0xf]  ;;  %s853_s12 = scalar_lea.hbm %s1270_s4, 16 }
  0x3c   : > { %282 = vst [vmem:[#allocation3 + $0x70] sm:$0xff] %v914_v11  ;;  %vm1111_vm11 = vmand %vm1094_vm8, %vm312_vm7 }
  0x3d   : > { %v1053_v5 = vld [vmem:[#allocation2] sm:$0x1f]  ;;  %283 = vst [vmem:[#allocation3 + $0x80] sm:$0xff] %v914_v11  ;;  %vm1123_vm1 = vmand %vm383_vm13, %vm385_vm15  ;;  %vm304_vm15 = vcmp.ge.s32.totalorder %v302_v50, 0 }
  0x3e   : > { %458 = vrot.lane.b32.xlu1 %v1053_v5, %s906_s21  ;;  %477 = vrot.lane.b32.xlu0 %v1053_v5, %s907_s27  ;;  %v1058_v6 = vld [vmem:[#allocation2 + $0x8] sm:$0x1f]  ;;  %284 = vst [vmem:[#allocation3 + $0x88] sm:$0xff] %v914_v11  ;;  %v408_v30 = vsel %vm1119_vm0, %v1053_v5, 0.0  ;;  %vm421_vm13 = vmand %vm1119_vm0, %vm363_vm2 }
  0x3f   : > { %431 = vrot.lane.b32.xlu2 %v1053_v5, %s908_s28  ;;  %285 = vst [vmem:[#allocation3 + $0x40] sm:$0xff] %v914_v11  ;;  %v409_v33 = vsel %vm1123_vm1, %v1058_v6, 0.0 }
  0x40   : > { %286 = vst [vmem:[#allocation3 + $0x50] sm:$0xff] %v914_v11 }
  0x41   : > { %287 = vst [vmem:[#allocation3 + $0x28] sm:$0xff] %v914_v11 }
  0x42   : > { %290 = vst [vmem:[#allocation3 + $0x30] sm:$0xff] %v914_v11 }
  0x43   : > { %291 = vst [vmem:[#allocation3 + $0x18] sm:$0xff] %v914_v11 }
  0x44   : > { %292 = vst [vmem:[#allocation3 + $0x68] sm:$0xff] %v914_v11 }
  0x45   : > { %293 = vst [vmem:[#allocation3 + $0x60] sm:$0xff] %v914_v11 }
  0x46   : > { %460 = vrot.lane.b32.xlu1 %v1058_v6, %s906_s21  ;;  %479 = vrot.lane.b32.xlu0 %v1058_v6, %s907_s27  ;;  %410 = vst [vmem:[#allocation3 + $0x88] sm:$0x1f] %v408_v30  ;;  %s588_s21 = sshll.u32 %s243_s25, 4  ;;  %s590_s27 = sshll.u32 %s586_s24, 4  ;;  %s589_s21 = int_to_ptr.vmem [resolvable:$true] %s588_s21  ;;  %s591_s27 = int_to_ptr.hbm [resolvable:$true] %s590_s27 }
  0x47   : > { %433 = vrot.lane.b32.xlu2 %v1058_v6, %s908_s28  ;;  %411 = vst [vmem:[#allocation3 + $0x40] sm:$0x1f] %v409_v33  ;;  %s847_s28 = sshra.s32 %s591_s27, 4  ;;  %s848_s28 = int_to_ptr.hbm [resolvable:$true] %s847_s28 }
  0x48   : > { %p854_p10 = scmp.lt.s32.totalorder %s848_s28, %s1270_s4 }
  0x4d   : > { %v505_v21 = vld [vmem:[#allocation3 + $0x88] sm:$0xff] }
  0x4e   : > { %414 = vrot.lane.b32.xlu1 %v1058_v6, %s909_s30  ;;  %412 = vrot.lane.b32.xlu0 %v1053_v5, %s909_s30  ;;  %v506_v24 = vld [vmem:[#allocation3 + $0x40] sm:$0xff]  ;;  %s849_s30 = scalar_lea.hbm %s848_s28, 8 }
  0x4f   : > { %375 = vrot.lane.b32.xlu2 %v1053_v5, %s910_s5  ;;  %p850_p1 = scmp.ne.s32.totalorder %s848_s28, %s849_s30  ;;  %p855_p2 = scmp.lt.s32.totalorder %s853_s12, %s849_s30 }
  0x51   : > { %p851_p4 = pnand %p850_p1, %p1007_p3  ;;  %p856_p11 = por %p855_p2, %p854_p10 }
  0x53   : > { %p852_p9 = pneg %p851_p4 }
  0x55   : > { %p857_p12 = pnand %p856_p11, %p852_p9 }
  0x56   : > { %350 = vrot.lane.b32.xlu1 %v1053_v5, %s911_s9  ;;  %377 = vrot.lane.b32.xlu0 %v1058_v6, %s910_s5 }
  0x57   : > { %352 = vrot.lane.b32.xlu2 %v1058_v6, %s911_s9 }
  0x5e   : > { %329 = vrot.lane.b32.xlu1 %v1058_v6, %s912_s10  ;;  %327 = vrot.lane.b32.xlu0 %v1053_v5, %s912_s10 }
  0x5f   : > { %294 = vrot.lane.b32.xlu2 %v1053_v5, %s913_s11 }
  0x66   : > { %296 = vrot.lane.b32.xlu0 %v1058_v6, %s913_s11  ;;  %518 = vperm.xlu1 %771, %v515_v62  }
  0x99   : > { %v432_v19 = vpop.permute.xlu2 %431 }
  0xa1   : > { %v434_v25 = vpop.permute.xlu2 %433 }
  0xa2   : > { %v436_v27 = vsel %vm435_vm9, %v432_v19, %v434_v25  ;;  %v437_v28 = vsel %vm435_vm9, %v434_v25, %v432_v19  ;;  %vm481_vm9 = vcmp.lt.s32.totalorder %v1073_v7, 111 }
  0xa3   : > { %v454_v31 = vsel %vm1103_vm10, %v436_v27, 0.0  ;;  %v455_v32 = vsel %vm1111_vm11, %v437_v28, 0.0  ;;  %vm486_vm10 = vmand %vm1089_vm6, %vm363_vm2 }
  0xa4   : > { %456 = vst [vmem:[#allocation3 + $0x10] sm:$0x1f] %v454_v31  ;;  %vm487_vm11 = vmand %vm1094_vm8, %vm364_vm3 }
  0xa5   : > { %457 = vst [vmem:[#allocation3 + $0x48] sm:$0x1f] %v455_v32 }
  0xa9   : > { %v376_v48 = vpop.permute.xlu2 %375 }
  0xab   : > { %v509_v5 = vld [vmem:[#allocation3 + $0x10] sm:$0xff] }
  0xac   : > { %v510_v10 = vld [vmem:[#allocation3 + $0x48] sm:$0xff] }
  0xb0   : > { %v459_v34 = vpop.permute.xlu1 %458  ;;  %v478_v35 = vpop.permute.xlu0 %477 }
  0xb1   : > { %v353_v1 = vpop.permute.xlu2 %352 }
  0xb8   : > { %v461_v38 = vpop.permute.xlu1 %460  ;;  %v480_v39 = vpop.permute.xlu0 %479 }
  0xb9   : > { %v463_v40 = vsel %vm462_vm4, %v459_v34, %v461_v38  ;;  %v464_v41 = vsel %vm462_vm4, %v461_v38, %v459_v34  ;;  %v482_v42 = vsel %vm481_vm9, %v478_v35, %v480_v39  ;;  %v483_v43 = vsel %vm481_vm9, %v480_v39, %v478_v35  ;;  %vm1162_vm9 = vmand %vm1119_vm0, %vm311_vm5  ;;  %v295_v35 = vpop.permute.xlu2 %294 }
  0xba   : > { %v473_v44 = vsel %vm1089_vm6, %v463_v40, 0.0  ;;  %v474_v45 = vsel %vm1094_vm8, %v464_v41, 0.0  ;;  %v492_v46 = vsel %vm486_vm10, %v482_v42, 0.0  ;;  %v493_v47 = vsel %vm487_vm11, %v483_v43, 0.0  ;;  %vm422_vm6 = vmand %vm1123_vm1, %vm364_vm3 }
  0xbb   : > { %475 = vst [vmem:[#allocation3 + $0x30] sm:$0x1f] %v473_v44  ;;  %vm303_vm8 = vcmp.ge.s32.totalorder %v301_v49, 0  ;;  %vm306_vm4 = vcmp.lt.s32.totalorder %v302_v50, 16  ;;  %vm379_vm0 = vcmp.lt.s32.totalorder %v1073_v7, 1 }
  0xbc   : > { %476 = vst [vmem:[#allocation3 + $0x18] sm:$0x1f] %v474_v45  ;;  %vm1166_vm10 = vmand %vm303_vm8, %vm305_vm14 }
  0xbd   : > { %494 = vst [vmem:[#allocation3 + $0x68] sm:$0x1f] %v492_v46  ;;  %vm1170_vm11 = vmand %vm304_vm15, %vm306_vm4 }
  0xbe   : > { %495 = vst [vmem:[#allocation3 + $0x60] sm:$0x1f] %v493_v47  ;;  %vm313_vm8 = vmand %vm1166_vm10, %vm311_vm5  ;;  %vm521_vm5 = vcmask 588800  }
  0xbf   : > { %vm314_vm14 = vmand %vm1170_vm11, %vm312_vm7 }
  0xc0   : > { %v415_v51 = vpop.permute.xlu1 %414  ;;  %v413_v52 = vpop.permute.xlu0 %412 }
  0xc1   : > { %v417_v53 = vsel %vm416_vm12, %v413_v52, %v415_v51  ;;  %v418_v54 = vsel %vm416_vm12, %v415_v51, %v413_v52  ;;  %vm1182_vm12 = vmand %vm1123_vm1, %vm312_vm7  ;;  %vm570_vm7 = vcmask 1043456  }
  0xc2   : > { %v427_v55 = vsel %vm421_vm13, %v417_v53, 0.0  ;;  %v428_v56 = vsel %vm422_vm6, %v418_v54, 0.0  ;;  %v511_v63 = vld [vmem:[#allocation3 + $0x30] sm:$0xff]  ;;  %vm354_vm13 = vcmp.lt.s32.totalorder %v1073_v7, 15  ;;  %vm1190_vm6 = vmand %vm1166_vm10, %vm363_vm2  ;;  %vm331_vm2 = vcmp.lt.s32.totalorder %v1073_v7, 16 }
  0xc3   : > { %429 = vst [vmem:[#allocation3 + $0x50] sm:$0x1f] %v427_v55  ;;  %v512_v3 = vld [vmem:[#allocation3 + $0x18] sm:$0xff]  ;;  %vm1197_vm1 = vmand %vm1170_vm11, %vm364_vm3  ;;  %vm298_vm3 = vcmp.lt.s32.totalorder %v1073_v7, 17 }
  0xc4   : > { %430 = vst [vmem:[#allocation3 + $0x28] sm:$0x1f] %v428_v56  ;;  %v513_v58 = vld [vmem:[#allocation3 + $0x68] sm:$0xff] }
  0xc5   : > { %532 = vmatpush.msra.mxu0 %v513_v58  ;;  %v514_v60 = vld [vmem:[#allocation3 + $0x60] sm:$0xff] }
  0xc6   : > { %552 = vmatpush.msra.mxu1 %v514_v60 }
  0xc7   : > { %533 = vmatpush.msra.mxu0 %v511_v63 }
  0xc8   : > { %553 = vmatpush.msra.mxu1 %v512_v3  ;;  %v351_v6 = vpop.permute.xlu1 %350  ;;  %v378_v8 = vpop.permute.xlu0 %377 }
  0xc9   : > { %534 = vmatpush.msra.mxu0 %v509_v5  ;;  %v380_v11 = vsel %vm379_vm0, %v376_v48, %v378_v8  ;;  %v381_v12 = vsel %vm379_vm0, %v378_v8, %v376_v48  ;;  %v355_v13 = vsel %vm354_vm13, %v351_v6, %v353_v1  ;;  %v356_v14 = vsel %vm354_vm13, %v353_v1, %v351_v6 }
  0xca   : > { %554 = vmatpush.msra.mxu1 %v510_v10  ;;  %v396_v15 = vsel %vm1162_vm9, %v381_v12, 0.0  ;;  %v397_v16 = vsel %vm1182_vm12, %v380_v11, 0.0  ;;  %v507_v17 = vld [vmem:[#allocation3 + $0x50] sm:$0xff]  ;;  %v371_v19 = vsel %vm1190_vm6, %v356_v14, 0.0  ;;  %v372_v23 = vsel %vm1197_vm1, %v355_v13, 0.0 }
  0xcb   : > { %398 = vst [vmem:[#allocation3 + $0x70] sm:$0x1f] %v396_v15  ;;  %535 = vmatpush.msra.mxu0 %v507_v17  ;;  %v508_v22 = vld [vmem:[#allocation3 + $0x28] sm:$0xff] }
  0xcc   : > { %399 = vst [vmem:[#allocation3 + $0x80] sm:$0x1f] %v397_v16  ;;  %555 = vmatpush.msra.mxu1 %v508_v22 }
  0xcd   : > { %373 = vst [vmem:[#allocation3 + $0x20] sm:$0x1f] %v371_v19  ;;  %536 = vmatpush.msra.mxu0 %v505_v21 }
  0xce   : > { %374 = vst [vmem:[#allocation3 + $0x8] sm:$0x1f] %v372_v23  ;;  %556 = vmatpush.msra.mxu1 %v506_v24 }
  0xd0   : > { %v330_v25 = vpop.permute.xlu1 %329  ;;  %v328_v26 = vpop.permute.xlu0 %327 }
  0xd1   : > { %v332_v27 = vsel %vm331_vm2, %v328_v26, %v330_v25  ;;  %v333_v28 = vsel %vm331_vm2, %v330_v25, %v328_v26 }
  0xd2   : > { %v346_v29 = vsel %vm1166_vm10, %v333_v28, 0.0  ;;  %v347_v30 = vsel %vm1170_vm11, %v332_v27, 0.0  ;;  %v503_v31 = vld [vmem:[#allocation3 + $0x70] sm:$0xff] }
  0xd3   : > { %348 = vst [vmem:[#allocation3 + $0x78] sm:$0x1f] %v346_v29  ;;  %537 = vmatpush.msra.mxu0 %v503_v31  ;;  %v504_v32 = vld [vmem:[#allocation3 + $0x80] sm:$0xff] }
  0xd4   : > { %349 = vst [vmem:[#allocation3 + $0x58] sm:$0x1f] %v347_v30  ;;  %557 = vmatpush.msra.mxu1 %v504_v32  ;;  %v501_v33 = vld [vmem:[#allocation3 + $0x20] sm:$0xff] }
  0xd5   : > { %538 = vmatpush.msra.mxu0 %v501_v33  ;;  %v502_v34 = vld [vmem:[#allocation3 + $0x8] sm:$0xff] }
  0xd6   : > { %558 = vmatpush.msra.mxu1 %v502_v34 }
  0xd8   : > { %v297_v36 = vpop.permute.xlu0 %296  ;;  %v519_v43 = vpop.permute.xlu1 %518 }
  0xd9   : > { %v299_v37 = vsel %vm298_vm3, %v295_v35, %v297_v36  ;;  %v300_v38 = vsel %vm298_vm3, %v297_v36, %v295_v35 }
  0xda   : > { %v323_v39 = vsel %vm313_vm8, %v300_v38, 0.0  ;;  %v324_v40 = vsel %vm314_vm14, %v299_v37, 0.0  ;;  %v499_v41 = vld [vmem:[#allocation3 + $0x78] sm:$0xff] }
  0xdb   : > { %325 = vst [vmem:[#allocation3] sm:$0x1f] %v323_v39  ;;  %539 = vmatpush.msra.mxu0 %v499_v41  ;;  %v500_v7 = vld [vmem:[#allocation3 + $0x58] sm:$0xff] }
  0xdc   : > { %326 = vst [vmem:[#allocation3 + $0x38] sm:$0x1f] %v324_v40  ;;  %559 = vmatpush.msra.mxu1 %v500_v7 }
  0xe2   : > { %v497_v42 = vld [vmem:[#allocation3] sm:$0xff] }
  0xe3   : > { %540 = vmatpush.msra.mxu0 %v497_v42  ;;  %v498_v20 = vld [vmem:[#allocation3 + $0x38] sm:$0xff] }
  0xe4   : > { %560 = vmatpush.msra.mxu1 %v498_v20  ;;  %695 = vmatmul.msk.f32.vlgmr.msra.gmra.mxu0 %vm521_vm5, %v496_v18 }
  0xe5   : > { %696 = vmatmul.msk.f32.vlgmr.msra.gmra.mxu1 %vm521_vm5, %v496_v18 }
 0x161   : > { %v542_v44 = vpop.f32.mrf.mxu0 }
 0x162   : > { %v562_v45 = vpop.f32.mrf.mxu1  ;;  %v543_v46 = vadd.f32 %v542_v44, %v519_v43 }
 0x163   : > { %v563_v47 = vadd.f32 %v562_v45, %v519_v43 }
 0x164   : > { %v565_v49 = vmax.f32 %v543_v46, 0.0 }
 0x165   : > { %v566_v48 = vmax.f32 %v563_v47, 0.0 }
 0x167   : > { %v569_v50 = vrot.slane %v566_v48, 4 }
 0x169   : > { %v571_v51 = vsel %vm570_vm7, %v565_v49, %v569_v50 }
 0x16a   : > { %573 = vst [vmem:[%s243_s25] sm:$0xff] %v571_v51 }
 0x16b   : > { %860 = shalt.err (!%p857_p12)
}
 0x16c   : > { %710 = dma.vmem_to_hbm [thread:$0]  (%p1007_p3), %s589_s21, 128, %s591_s27, %s575_s19  }
 0x16d PF: > { %s602_s8 = sand.u32 1, %s891_s15   ;;  %p1300_p13 = scmp.ge.s32.totalorder %s903_s18, 2 }
 0x16e   : > { %s603_s13 = scalar_lea.sflag [#allocation6], %s602_s8 }
 0x16f   : > { %p721_p0 = pnand %p1300_p13, %p976_p6 }
 0x171   : > { %p722_p5 = pneg %p721_p0 }
 0x173   : > { %886 = dma.done.wait (%p722_p5), %s603_s13, 128  }
 0x174   : > { %888 = vsyncadd (%p722_p5), %s603_s13, 4294967168  ;;  %p18_p7 = scmp.ge.s32.totalorder %s994_s29, 4   ;;  %s1301_s15 = smov %s895_s16 }
 0x175   : > { %s1302_s16 = smov %s899_s17  ;;  %s1303_s17 = smov %s1003_s6 }
 0x176   : > { %s1304_s18 = smov %s994_s29  ;;  %20 = sbr.rel (!%p18_p7) target bundleno = 6 (0x6), region = 89 }
 0x17b   :  { %609 = vsyncpa [#allocation5], 1 }
 0x17c   :  { %611 = vsyncpa [#allocation5 + $0x1], 1 }
 0x17d   :  { %612 = vsyncpa [#allocation8], 1 }
 0x17e   :  { %613 = vsyncpa [#allocation6], 1 }
 0x17f   :  { %615 = vsyncpa [#allocation6 + $0x1], 1 }

</bundles_post_ra>
